<compile_context>
chip_gen: v6e
topology: v6e:2x2x1
jax: 0.10.0
libtpu: 0.0.40
codegen_flags: <defaults>
</compile_context>

<pallas_src>
import math

import jax
import jax.numpy as jnp
import numpy as np
from jax.experimental import pallas as pl
from jax.experimental.pallas import tpu as pltpu

KSIZE = 3  # conv kernel size


def _round_up(n, m):
    return ((n + m - 1) // m) * m


def token_embedding_kernel(x_ref, w_ref, o_ref):
    """One batch-group per grid step.

    x_ref : (TB, L, C)  input sequences (f32)
    w_ref : (3, C, D)   conv taps; w_ref[k][c, d] = weight[d, c, k]
    o_ref : (TB, L, D)  output tile (unpadded D)
    """
    x = x_ref[...]
    tb, L, C = x.shape
    D = o_ref.shape[-1]

    # Circular padding of the k=3 conv == per-sequence circular shifts.
    # Each tile holds whole sequences, so the roll never leaks across batches.
    x_prev = jnp.roll(x, 1, axis=1)    # x[b, (t-1) mod L, :]
    x_next = jnp.roll(x, -1, axis=1)   # x[b, (t+1) mod L, :]

    xc = x.reshape(tb * L, C)
    xp = x_prev.reshape(tb * L, C)
    xn = x_next.reshape(tb * L, C)

    acc = jnp.dot(xp, w_ref[0], preferred_element_type=jnp.float32)
    acc = acc + jnp.dot(xc, w_ref[1], preferred_element_type=jnp.float32)
    acc = acc + jnp.dot(xn, w_ref[2], preferred_element_type=jnp.float32)

    o_ref[...] = acc.reshape(tb, L, D).astype(o_ref.dtype)


def _pick_batch_tile(B, L, C, D, vmem_block_budget=24 << 20):
    """Pick how many whole sequences go in one grid step."""
    # f32 bytes per batch element per step: double-buffered x & out blocks,
    # plus in-kernel temporaries (two rolled copies + f32 accumulator).
    per_b = 4 * L * (2 * C + 2 * D + 3 * C + D)
    tb = max(1, vmem_block_budget // max(per_b, 1))
    if B >= 2:
        # keep >= 2 grid steps so v7x's two TensorCores both get work
        tb = min(tb, -(-B // 2))
    return int(min(tb, B))


def token_embedding(x, weight, *, batch_tile=None):
    """x: [B, L, c_in]; weight: [d_model, c_in, 3] (PyTorch Conv1d layout).

    Returns [B, L, d_model] (same dtype as x)."""
    B, L, C = x.shape
    D, C2, K = weight.shape
    assert K == KSIZE and C2 == C

    # (D, C, 3) -> (3, C, D); w[k] is the tap applied to x[:, (t-1+k) mod L, :]
    w = jnp.transpose(weight, (2, 1, 0))

    TB = batch_tile if batch_tile is not None else _pick_batch_tile(B, L, C, D)
    # TODO(synk): for extremely long sequences where a single (1, L, C)+(1, L, D)
    # block exceeds VMEM, tile L as well (needs a 2-row circular halo per tile).
    Bp = _round_up(B, TB)
    x_p = jnp.pad(x, ((0, Bp - B), (0, 0), (0, 0))) if Bp != B else x

    out = pl.pallas_call(
        token_embedding_kernel,
        out_shape=jax.ShapeDtypeStruct((Bp, L, D), x.dtype),
        grid_spec=pltpu.PrefetchScalarGridSpec(
            num_scalar_prefetch=0,
            grid=(Bp // TB,),
            in_specs=[
                pl.BlockSpec((TB, L, C), lambda i: (i, 0, 0)),
                pl.BlockSpec((KSIZE, C, D), lambda i: (0, 0, 0)),  # resident
            ],
            out_specs=pl.BlockSpec((TB, L, D), lambda i: (i, 0, 0)),
        ),
        compiler_params=pltpu.CompilerParams(
            dimension_semantics=("parallel",),
            vmem_limit_bytes=48 * 1024 * 1024,  # > v5e default, < v7x physical
        ),
    )(x_p, w)

    return out[:B] if Bp != B else out


def token_embedding_reference(x, weight):
    """Pure-JAX f32 reference of the circular conv (for correctness check)."""
    w = jnp.transpose(weight, (2, 1, 0))  # (3, C, D)
    x_prev = jnp.roll(x, 1, axis=1)
    x_next = jnp.roll(x, -1, axis=1)
    return (x_prev @ w[0]) + (x @ w[1]) + (x_next @ w[2])


if __name__ == "__main__":
    # Small, deterministic example consistent with the module's forward:
    # x: [batch, seq_len, c_in]
    B, L, C_IN, D_MODEL = 2, 16, 4, 32

    key = jax.random.PRNGKey(0)
    kx, kw = jax.random.split(key)

    x = jax.random.normal(kx, (B, L, C_IN), dtype=jnp.float32)

    # Deterministic kaiming_normal_(mode='fan_in', nonlinearity='leaky_relu')
    # for Conv1d weight of shape [d_model, c_in, kernel_size].
    fan_in = C_IN * KSIZE
    gain = math.sqrt(2.0 / (1.0 + 0.0 ** 2))
    std = gain / math.sqrt(fan_in)
    weight = std * jax.random.normal(kw, (D_MODEL, C_IN, KSIZE), dtype=jnp.float32)

    out = jax.block_until_ready(token_embedding(x, weight))
    ref = token_embedding_reference(x, weight)

    assert out.shape == (B, L, D_MODEL)
    np.testing.assert_allclose(np.asarray(out), np.asarray(ref), rtol=1e-2, atol=1e-2)

    print("KERNEL_OK")
</pallas_src>

<mosaic_0001>
module attributes {stable_mosaic.version = 11 : i64} {
  func.func @token_embedding_kernel(%arg0: i32, %arg1: memref<1x16x4xf32, #tpu.memory_space<vmem>>, %arg2: memref<3x4x32xf32, #tpu.memory_space<vmem>>, %arg3: memref<1x16x32xf32, #tpu.memory_space<vmem>>) attributes {dimension_semantics = [#tpu.dimension_semantics<parallel>], iteration_bounds = array<i64: 2>, scalar_prefetch = 0 : i64, scratch_operands = 0 : i64, tpu.core_type = #tpu.core_type<tc>, window_params = [{transform_indices = @transform_0, window_bounds = array<i64: 1, 16, 4>}, {pipeline_mode = #tpu.pipeline_mode<synchronous>, transform_indices = @transform_1, window_bounds = array<i64: 3, 4, 32>}, {transform_indices = @transform_2, window_bounds = array<i64: 1, 16, 32>}]} {
    %c0 = arith.constant 0 : index
    %c0_0 = arith.constant 0 : index
    %c0_1 = arith.constant 0 : index
    %0 = vector.load %arg1[%c0, %c0_0, %c0_1] : memref<1x16x4xf32, #tpu.memory_space<vmem>>, vector<1x16x4xf32>
    %1 = vector.extract_strided_slice %0 {offsets = [0, 15, 0], sizes = [1, 1, 4], strides = [1, 1, 1]} : vector<1x16x4xf32> to vector<1x1x4xf32>
    %2 = vector.extract_strided_slice %0 {offsets = [0, 0, 0], sizes = [1, 15, 4], strides = [1, 1, 1]} : vector<1x16x4xf32> to vector<1x15x4xf32>
    %3 = tpu.concatenate %1, %2 in 1 : vector<1x1x4xf32>, vector<1x15x4xf32> -> vector<1x16x4xf32>
    %4 = vector.extract_strided_slice %0 {offsets = [0, 1, 0], sizes = [1, 15, 4], strides = [1, 1, 1]} : vector<1x16x4xf32> to vector<1x15x4xf32>
    %5 = vector.extract_strided_slice %0 {offsets = [0, 0, 0], sizes = [1, 1, 4], strides = [1, 1, 1]} : vector<1x16x4xf32> to vector<1x1x4xf32>
    %6 = tpu.concatenate %4, %5 in 1 : vector<1x15x4xf32>, vector<1x1x4xf32> -> vector<1x16x4xf32>
    %7 = vector.shape_cast %0 : vector<1x16x4xf32> to vector<16x4xf32>
    %8 = vector.shape_cast %3 : vector<1x16x4xf32> to vector<16x4xf32>
    %9 = vector.shape_cast %6 : vector<1x16x4xf32> to vector<16x4xf32>
    %c0_2 = arith.constant 0 : index
    %c0_3 = arith.constant 0 : index
    %c0_4 = arith.constant 0 : index
    %10 = vector.load %arg2[%c0_2, %c0_3, %c0_4] : memref<3x4x32xf32, #tpu.memory_space<vmem>>, vector<1x4x32xf32>
    %11 = vector.shape_cast %10 : vector<1x4x32xf32> to vector<4x32xf32>
    %cst = arith.constant dense<0.000000e+00> : vector<16x32xf32>
    %12 = tpu.matmul %8, %11, %cst {dimension_numbers = #tpu.dot_dimension_numbers<[1], [0], [0], [1], [0, 0, 1, 1], [], []>} : vector<16x4xf32>, vector<4x32xf32>, vector<16x32xf32> -> vector<16x32xf32>
    %c1 = arith.constant 1 : index
    %c0_5 = arith.constant 0 : index
    %c0_6 = arith.constant 0 : index
    %13 = vector.load %arg2[%c1, %c0_5, %c0_6] : memref<3x4x32xf32, #tpu.memory_space<vmem>>, vector<1x4x32xf32>
    %14 = vector.shape_cast %13 : vector<1x4x32xf32> to vector<4x32xf32>
    %cst_7 = arith.constant dense<0.000000e+00> : vector<16x32xf32>
    %15 = tpu.matmul %7, %14, %cst_7 {dimension_numbers = #tpu.dot_dimension_numbers<[1], [0], [0], [1], [0, 0, 1, 1], [], []>} : vector<16x4xf32>, vector<4x32xf32>, vector<16x32xf32> -> vector<16x32xf32>
    %16 = arith.addf %12, %15 : vector<16x32xf32>
    %c2 = arith.constant 2 : index
    %c0_8 = arith.constant 0 : index
    %c0_9 = arith.constant 0 : index
    %17 = vector.load %arg2[%c2, %c0_8, %c0_9] : memref<3x4x32xf32, #tpu.memory_space<vmem>>, vector<1x4x32xf32>
    %18 = vector.shape_cast %17 : vector<1x4x32xf32> to vector<4x32xf32>
    %cst_10 = arith.constant dense<0.000000e+00> : vector<16x32xf32>
    %19 = tpu.matmul %9, %18, %cst_10 {dimension_numbers = #tpu.dot_dimension_numbers<[1], [0], [0], [1], [0, 0, 1, 1], [], []>} : vector<16x4xf32>, vector<4x32xf32>, vector<16x32xf32> -> vector<16x32xf32>
    %20 = arith.addf %16, %19 : vector<16x32xf32>
    %21 = vector.shape_cast %20 : vector<16x32xf32> to vector<1x16x32xf32>
    %c0_11 = arith.constant 0 : index
    %c0_12 = arith.constant 0 : index
    %c0_13 = arith.constant 0 : index
    %22 = vector.load %arg3[%c0_11, %c0_12, %c0_13] : memref<1x16x32xf32, #tpu.memory_space<vmem>>, vector<1x16x32xf32>
    tpu.vector_store %arg3[%c0_11, %c0_12, %c0_13], %21 {strides = array<i32>} : memref<1x16x32xf32, #tpu.memory_space<vmem>>, vector<1x16x32xf32>,
    return
  }
  func.func @transform_0(%arg0: i32) -> (i32, i32, i32) {
    %c0_i32 = arith.constant 0 : i32
    %c0_i32_0 = arith.constant 0 : i32
    %c0_i32_1 = arith.constant 0 : i32
    return %arg0, %c0_i32, %c0_i32_0 : i32, i32, i32
  }
  func.func @transform_1(%arg0: i32) -> (i32, i32, i32) {
    %c0_i32 = arith.constant 0 : i32
    %c0_i32_0 = arith.constant 0 : i32
    %c0_i32_1 = arith.constant 0 : i32
    %c0_i32_2 = arith.constant 0 : i32
    return %c0_i32, %c0_i32_0, %c0_i32_1 : i32, i32, i32
  }
  func.func @transform_2(%arg0: i32) -> (i32, i32, i32) {
    %c0_i32 = arith.constant 0 : i32
    %c0_i32_0 = arith.constant 0 : i32
    %c0_i32_1 = arith.constant 0 : i32
    return %arg0, %c0_i32, %c0_i32_0 : i32, i32, i32
  }
}

</mosaic_0001>

<bundles_post_ra>
// kernel: tpu_custom_call.1
= control target key start
LH: loop header
LB: loop body
LE: loop exit
PB: predicated region body
PF: predicated region fallthrough
CT: control target
= control target key end

     0   :  { %7 = vsyncpa [#allocation3], 0  ;;  %s789_s0 = inlined_call_operand.vmem [shape: f32[2,16,4], index: 0, kind: input, shape index: {}]   ;;  %s790_s1 = inlined_call_operand.vmem [shape: f32[3,4,32], index: 1, kind: input, shape index: {}]   ;;  %s791_s2 = inlined_call_operand.hbm [shape: f32[2,16,32], index: 2, kind: output, shape index: {}]  }
   0x1   :  { %9 = vsyncpa [#allocation3 + $0x1], 0  ;;  %s666_s9 = smov 0   ;;  %s668_s10 = smov 0  }
   0x2   :  { %s670_s11 = smov 0   ;;  %s672_s12 = smov 0  }
   0x3 LB: > { %s687_s13 = sadd.s32 4294967295, %s646_s12   ;;  %s496_s14 = sadd.s32 4294967294, %s646_s12   ;;  %s646_s12 = sphi %s672_s12, %s797_s12   ;;  %s642_s11 = sphi %s670_s11, %s796_s11   ;;  %s638_s10 = sphi %s668_s10, %s795_s10   ;;  %s634_s9 = sphi %s666_s9, %s794_s9  }
   0x4   : > { %s691_s15 = sadd.s32 1, %s646_s12   ;;  %s69_s16 = sadd.s32 1, %s642_s11 }
   0x5   : > { %s66_s17 = ssub.s32 %s646_s12, %s691_s15  ;;  %p79_p0 = scmp.ne.s32.totalorder %s642_s11, %s638_s10 }
   0x6   : > { %p67_p1 = scmp.eq.s32.totalorder %s66_s17, 0  ;;  %p80_p2 = scmp.eq.s32.totalorder %s687_s13, 1 }
   0x7   : > { %p85_p3 = scmp.ne.s32.totalorder %s638_s10, %s634_s9  ;;  %p86_p4 = scmp.eq.s32.totalorder %s496_s14, 1 }
   0x8   : > { %s702_s18 = scalar_select %p67_p1, %s642_s11, %s69_s16  }
   0x9   : > { %p704_p5 = por %p80_p2, %p79_p0  ;;  %p708_p6 = por %p86_p4, %p85_p3 }
   0xa   : > { %p499_p7 = scmp.ge.s32.totalorder %s646_s12, 1  ;;  %p115_p8 = scmp.lt.s32.totalorder %s646_s12, 3 }
   0xc   : > { %p116_p9 = pnand %p499_p7, %p115_p8 }
   0xd   : > { %p137_p10 = scmp.lt.s32.totalorder (!%p116_p9), %s687_s13, 1  ;;  %s134_s4 = sand.u32 (!%p116_p9), 1, %s638_s10  }
   0xe   : > { %119 = sbr.rel (%p116_p9) target bundleno = 241 (0xf1), region = 28  ;;  %s500_s5 = sshll.u32 (!%p116_p9), %s134_s4, 4 }
   0xf   : > { %s136_s6 = scalar_lea.vmem (!%p116_p9), [#allocation2], %s500_s5  ;;  %s520_s8 = sshll.u32 (!%p116_p9), %s687_s13, 8 }
  0x10   : > { %s434_s7 = sshll.u32 (!%p116_p9), %s136_s6, 4  ;;  %s747_s17 = scalar_lea.hbm (!%p116_p9), %s791_s2, %s520_s8  ;;  %s742_s7 = int_to_ptr.vmem [resolvable:$true] %s434_s7 }
  0x11   : > { %s749_s21 = scalar_lea.sflag (!%p116_p9), [#allocation3], %s134_s4  ;;  %s648_s22 = smov (!%p116_p9), [#allocation2]  }
  0x12   : > { %s590_s23 = sshll.u32 (!%p116_p9), %s648_s22, 4  ;;  %s591_s23 = int_to_ptr.vmem [resolvable:$false] %s590_s23 }
  0x13   : > { %v503_v0 = vld [vmem:[%s790_s1 + $0x4] sm:$0xf]  ;;  %vm168_vm0 = vcmask 1043456   ;;  %v510_v1 = vld [vmem:[%s790_s1 + $0x8] sm:$0xf]  ;;  %s138_s27 = scalar_select %p137_p10, %s687_s13, 1 }
  0x14   : > { %530 = vmatprep.subr.msk.mxu0 %vm168_vm0, %v503_v0  ;;  %v160_v2 = vld [vmem:[%s790_s1] sm:$0xf]  ;;  %vm163_vm1 = vcmask 31744   ;;  %vm148_vm2 = vcmask 1040384   ;;  %vm153_vm3 = vcmask 1046528   ;;  %vm417_vm4 = vcmask 261120   ;;  %p593_p0 = scmp.lt.s32.totalorder %s742_s7, %s591_s23 }
  0x15   : > { %531 = vmatpush3.msk.msra.mxu0 %vm168_vm0, %v503_v0  ;;  %535 = vmatprep.subr.msk.mxu1 %vm168_vm0, %v160_v2  ;;  %s519_s28 = sshll.u32 %s138_s27, 4  ;;  %s586_s13 = scalar_lea.vmem %s742_s7, 256 }
  0x16   : > { %540 = vmatprep.subr.msk.mxu0 %vm168_vm0, %v510_v1  ;;  %536 = vmatpush3.msk.msra.mxu1 %vm168_vm0, %v160_v2  ;;  %s141_s3 = scalar_lea.vmem %s789_s0, %s519_s28  ;;  %p587_p11 = scmp.ne.s32.totalorder %s742_s7, %s586_s13 }
  0x17   : > { %v142_v3 = vld [vmem:[%s141_s3] sm:$0xff]  ;;  %v143_v4 = vld [vmem:[%s141_s3 + $0x8] sm:$0xff]  ;;  %s592_s24 = scalar_lea.vmem %s591_s23, 512 }
  0x18   : > { %v149_v5 = vrot.slane %v142_v3, 7  ;;  %v154_v6 = vrot.slane %v142_v3, 1  ;;  %532 = vmatprep.mubr.msk.f32.mxu0 %vm163_vm1, %v142_v3  ;;  %v155_v7 = vrot.slane %v143_v4, 1  ;;  %v145_v8 = vrot.slane %v143_v4, 7  ;;  %p588_p12 = pnand %p587_p11, %p704_p5  ;;  %p594_p1 = scmp.lt.s32.totalorder %s592_s24, %s586_s13 }
  0x19   : > { %533 = vmatmul.mubr.msk.f32.vlgmr.msra.gmra.mxu0 %vm163_vm1, %v143_v4 }
  0x1a   : > { %541 = vmatpush3.msk.msra.mxu0 %vm168_vm0, %v510_v1  ;;  %v152_v9 = vsel %vm148_vm2, %v145_v8, %v149_v5  ;;  %v150_v10 = vsel %vm148_vm2, %v149_v5, %v145_v8  ;;  %v156_v11 = vsel %vm153_vm3, %v154_v6, %v155_v7  ;;  %v159_v12 = vsel %vm153_vm3, %v155_v7, %v154_v6  ;;  %p589_p13 = pneg %p588_p12  ;;  %p595_p2 = por %p594_p1, %p593_p0 }
  0x1b   : > { %537 = vmatprep.mubr.msk.f32.mxu1 %vm163_vm1, %v152_v9  ;;  %542 = vmatprep.mubr.msk.f32.mxu0 %vm163_vm1, %v156_v11 }
  0x1c   : > { %538 = vmatmul.mubr.msk.f32.vlgmr.msra.gmra.mxu1 %vm163_vm1, %v150_v10  ;;  %p596_p3 = pnand %p595_p2, %p589_p13 }
  0x1d   : > { %543 = vmatmul.mubr.msk.f32.vlgmr.msra.gmra.mxu0 %vm163_vm1, %v159_v12 }
  0xd9   : > { %v534_v13 = vpop.f32.mrf.mxu0 }
  0xdb   : > { %v238_v14 = vpop.f32.mrf.mxu0 }
  0xdc   : > { %v539_v15 = vpop.f32.mrf.mxu1 }
  0xdd   : > { %v327_v16 = vadd.f32 %v539_v15, %v534_v13  ;;  %v544_v17 = vpop.f32.mrf.mxu0 }
  0xde   : > { %v321_v18 = vpop.f32.mrf.mxu1 }
  0xdf   : > { %v416_v19 = vadd.f32 %v544_v17, %v327_v16  ;;  %v322_v20 = vadd.f32 %v321_v18, %v238_v14  ;;  %v406_v21 = vpop.f32.mrf.mxu0 }
  0xe1   : > { %419 = vst.msk [vmem:[%s136_s6 + $0x8] sm:$0xff] %vm417_vm4, %v416_v19  ;;  %v415_v22 = vadd.f32 %v406_v21, %v322_v20 }
  0xe3   : > { %418 = vst.msk [vmem:[%s136_s6] sm:$0xff] %vm417_vm4, %v415_v22 }
  0xe4   : > { %599 = shalt.err (!%p596_p3)
}
  0xe5   : > { %s600_s25 = scalar_lea.hbm %s747_s17, 256  ;;  %s604_s28 = scalar_lea.hbm %s791_s2, 512 }
  0xe6   : > { %p601_p4 = scmp.ne.s32.totalorder %s747_s17, %s600_s25  ;;  %p605_p9 = scmp.lt.s32.totalorder %s747_s17, %s791_s2 }
  0xe7   : > { %p606_p10 = scmp.lt.s32.totalorder %s604_s28, %s600_s25 }
  0xe8   : > { %p602_p7 = pnand %p601_p4, %p704_p5 }
  0xe9   : > { %p607_p11 = por %p606_p10, %p605_p9 }
  0xea   : > { %p603_p8 = pneg %p602_p7 }
  0xec   : > { %p608_p12 = pnand %p607_p11, %p603_p8 }
  0xee   : > { %611 = shalt.err (!%p608_p12)
}
  0xef   : > { %s649_s3 = smov 128   ;;  %s650_s4 = smov 8  }
  0xf0   : > { %545 = dma.vmem_to_hbm [thread:$0]  (%p704_p5), %s742_s7, 256, %s747_s17, %s749_s21, %s649_s3, %s649_s3, %s650_s4  }
  0xf1 PF: > { %p551_p13 = scmp.ge.s32.totalorder %s646_s12, 2  ;;  %s449_s5 = sand.u32 1, %s634_s9  }
  0xf2   : > { %s450_s6 = scalar_lea.sflag [#allocation3], %s449_s5 }
  0xf3   : > { %p548_p0 = pnand %p551_p13, %p708_p6 }
  0xf5   : > { %p549_p1 = pneg %p548_p0 }
  0xf7   : > { %629 = dma.done.wait (%p549_p1), %s450_s6, 256  }
  0xf8   : > { %631 = vsyncadd (%p549_p1), %s450_s6, 4294967040  ;;  %p12_p2 = scmp.ge.s32.totalorder %s691_s15, 4   ;;  %s794_s9 = smov %s638_s10 }
  0xf9   : > { %s795_s10 = smov %s642_s11  ;;  %s796_s11 = smov %s702_s18 }
  0xfa   : > { %s797_s12 = smov %s691_s15  ;;  %14 = sbr.rel (!%p12_p2) target bundleno = 3 (0x3), region = 65 }
  0xff   :  { %455 = vsyncpa [#allocation3], 1 }
 0x100   :  { %457 = vsyncpa [#allocation3 + $0x1], 1 }

</bundles_post_ra>
